<compile_context>
chip_gen: v5e
topology: v5e:2x2
jax: 0.10.0
libtpu: 0.0.40
codegen_flags: <defaults>
</compile_context>

<pallas_src>
import functools

import jax
import jax.numpy as jnp
from jax import lax
from jax.experimental import pallas as pl
from jax.experimental.pallas import tpu as pltpu


def _round_up(x: int, m: int) -> int:
    return ((x + m - 1) // m) * m


# ---------------------------------------------------------------------------
# Kernel
# ---------------------------------------------------------------------------
def _scaled_logit_kernel(emb_ref, w_ref, o_ref, xn_ref, *, scale: float):
    """One (i, j) grid step.

    emb_ref: [TM, E]  input rows (input dtype), block re-used across all j
    w_ref:   [E, TN]  bf16 weight tile, native MXU feed (K on sublanes, N lane-dense)
    o_ref:   [TM, TN] logits tile
    xn_ref:  [TM, E]  bf16 scratch: normalized + pre-scaled rows
    """
    # Normalize this row tile only once per i.  j is the innermost grid axis
    # and is marked "arbitrary", so j == 0 always executes first for each i
    # and the scratch persists across the whole j sweep.
    @pl.when(pl.program_id(1) == 0)
    def _():
        x = emb_ref[...].astype(jnp.float32)                   # [TM, E]
        # scale / max(||x||, 1e-12) == scale * rsqrt(max(sum(x*x), 1e-24))
        # (torch.nn.functional.normalize eps semantics; the clamp also keeps
        #  padded all-zero rows finite: 0 * (scale * 1e12) == 0).
        sumsq = jnp.sum(x * x, axis=1, keepdims=True)          # [TM, 1]
        inv = scale * lax.rsqrt(jnp.maximum(sumsq, 1e-24))     # EUP rsqrt
        xn_ref[...] = (x * inv).astype(xn_ref.dtype)           # bf16 for the MXU

    # [TM, E] @ [E, TN] -> [TM, TN] with f32 accumulation on the MXU.
    o_ref[...] = jnp.dot(
        xn_ref[...], w_ref[...], preferred_element_type=jnp.float32
    ).astype(o_ref.dtype)


# ---------------------------------------------------------------------------
# One-time parameter preparation (do at load time, NOT per forward call)
# ---------------------------------------------------------------------------
def prepare_weight(weight: jax.Array, *, tn: int = 1024) -> jax.Array:
    """[n_classes, emb_size] (PyTorch nn.Linear layout) -> [emb_size, Cp] bf16.

    Transpose to the native MXU RHS layout, cast to bf16 and pad the class dim
    to the class-tile granularity once, so the hot path never materializes
    full C x E copies in HBM.
    """
    C, E = weight.shape
    TN = min(tn, _round_up(C, 128))
    Cp = _round_up(C, TN)
    w = weight.astype(jnp.bfloat16).T                          # [E, C]
    if Cp != C:
        w = jnp.pad(w, ((0, 0), (0, Cp - C)))
    return w


# ---------------------------------------------------------------------------
# Forward wrapper
# ---------------------------------------------------------------------------
# Conservative cross-generation tile budget (v7x: 64 MiB physical VMEM).
_VMEM_TILE_BUDGET = 24 * 1024 * 1024


def _vmem_need(tm, tn, e, emb_bytes, out_bytes):
    # emb + weight + out double buffers, plus the normalization scratch.
    return (2 * tm * e * emb_bytes
            + 2 * e * tn * 2
            + 2 * tm * tn * out_bytes
            + tm * e * 2)


def scaled_logit_classifier(
    emb: jax.Array,
    w_ec: jax.Array,
    scale: float,
    *,
    n_classes: int | None = None,
    tm: int = 512,      # v7x ridge ~384-512; raise to ~768-1024 on v6e for large B
    tn: int = 1024,
    out_dtype=None,
) -> jax.Array:
    """emb: [B, emb_size]; w_ec: prepared weight [emb_size, Cp] bf16 (see prepare_weight)."""
    B, E = emb.shape
    E2, Cin = w_ec.shape
    assert E == E2, "emb_size mismatch between features and prepared weight"
    n_classes = Cin if n_classes is None else n_classes
    assert n_classes <= Cin
    out_dtype = emb.dtype if out_dtype is None else out_dtype

    emb_bytes = jnp.dtype(emb.dtype).itemsize
    out_bytes = jnp.dtype(out_dtype).itemsize

    # MXU/lane-aligned tiles, clamped to the (padded) problem size.
    TM = min(tm, _round_up(B, 8))
    TN = min(tn, _round_up(Cin, 128))

    # Shrink tiles until the double-buffered working set fits the VMEM budget
    # (matters for large emb_size, especially on v7x / v5e's default limits).
    while _vmem_need(TM, TN, E, emb_bytes, out_bytes) > _VMEM_TILE_BUDGET:
        if TN >= TM and TN > 128:
            TN = max(128, (TN // 2 // 128) * 128)
        elif TM > 8:
            TM = max(8, (TM // 2 // 8) * 8)
        else:
            break

    Bp = _round_up(B, TM)
    Cp = _round_up(Cin, TN)

    if Bp != B:
        emb = jnp.pad(emb, ((0, Bp - B), (0, 0)))
    if Cp != Cin:
        # No-op when prepare_weight() used a compatible tn.
        w_ec = jnp.pad(w_ec, ((0, 0), (0, Cp - Cin)))

    grid = (Bp // TM, Cp // TN)
    kernel = functools.partial(_scaled_logit_kernel, scale=float(scale))

    vmem_limit = int(min(
        max(2 * _vmem_need(TM, TN, E, emb_bytes, out_bytes), 16 << 20), 56 << 20))

    cost = pl.CostEstimate(
        flops=2 * Bp * E * Cp,
        transcendentals=Bp,                       # one rsqrt per row (hoisted)
        bytes_accessed=(
            Bp * E * emb_bytes                    # emb read once
            + (Bp // TM) * E * Cp * 2             # weight bf16, re-streamed per row tile
            + Bp * Cp * out_bytes                 # logits write
        ),
    )

    out = pl.pallas_call(
        kernel,
        out_shape=jax.ShapeDtypeStruct((Bp, Cp), out_dtype),
        grid_spec=pltpu.PrefetchScalarGridSpec(
            num_scalar_prefetch=0,
            grid=grid,
            in_specs=[
                pl.BlockSpec((TM, E), lambda i, j: (i, 0)),   # emb rows (E un-tiled)
                pl.BlockSpec((E, TN), lambda i, j: (0, j)),   # weight, [E, Cp] layout
            ],
            out_specs=pl.BlockSpec((TM, TN), lambda i, j: (i, j)),
            scratch_shapes=[pltpu.VMEM((TM, E), jnp.bfloat16)],   # normalized rows
        ),
        # j must be "arbitrary": the normalization scratch written at j == 0 is
        # reused across the whole j sweep.  Megacore parallelism (v7x) comes
        # from the batch axis i.
        compiler_params=pltpu.CompilerParams(
            dimension_semantics=("parallel", "arbitrary"),
            vmem_limit_bytes=vmem_limit,
        ),
        cost_estimate=cost,
    )(emb, w_ec)

    return out[:B, :n_classes]


def _reference(emb, weight, scale):
    norm = jnp.maximum(jnp.linalg.norm(emb, axis=1, keepdims=True), 1e-12)
    return (emb / norm) @ weight.T * scale


if __name__ == "__main__":
    # Small shapes consistent with the module's forward: emb [B, emb_size].
    B, EMB_SIZE, N_CLASSES, SCALE = 8, 32, 16, 30

    key = jax.random.PRNGKey(0)
    k_emb, k_w = jax.random.split(key)

    emb = jax.random.normal(k_emb, (B, EMB_SIZE), dtype=jnp.float32)

    # Deterministic init matching nn.Linear default: U(-1/sqrt(emb_size), 1/sqrt(emb_size)).
    bound = 1.0 / (EMB_SIZE ** 0.5)
    weight = jax.random.uniform(
        k_w, (N_CLASSES, EMB_SIZE), dtype=jnp.float32, minval=-bound, maxval=bound
    )

    # One-time parameter prep (parameter-load time, not per call).
    w_ec = prepare_weight(weight)

    logits = scaled_logit_classifier(emb, w_ec, SCALE, n_classes=N_CLASSES)
    jax.block_until_ready(logits)

    ref = _reference(emb, weight, SCALE)
    assert logits.shape == (B, N_CLASSES)
    # Matmul runs in bf16 (f32 accumulate) -> loosened tolerance vs f32 reference.
    assert jnp.allclose(logits, ref, atol=1.5e-1, rtol=2e-2), "mismatch vs reference"

    print("KERNEL_OK")
</pallas_src>

<mosaic_0001>
module attributes {stable_mosaic.version = 11 : i64} {
  func.func @_scaled_logit_kernel(%arg0: i32, %arg1: i32, %arg2: memref<8x32xf32, #tpu.memory_space<vmem>>, %arg3: memref<32x128xbf16, #tpu.memory_space<vmem>>, %arg4: memref<8x128xf32, #tpu.memory_space<vmem>>, %arg5: memref<8x32xbf16, #tpu.memory_space<vmem>>) attributes {dimension_semantics = [#tpu.dimension_semantics<parallel>, #tpu.dimension_semantics<arbitrary>], iteration_bounds = array<i64: 1, 1>, scalar_prefetch = 0 : i64, scratch_operands = 1 : i64, tpu.core_type = #tpu.core_type<tc>, window_params = [{transform_indices = @transform_0, window_bounds = array<i64: 8, 32>}, {transform_indices = @transform_1, window_bounds = array<i64: 32, 128>}, {transform_indices = @transform_2, window_bounds = array<i64: 8, 128>}]} {
    %c0_i32 = arith.constant 0 : i32
    %0 = arith.cmpi eq, %arg1, %c0_i32 : i32
    %1 = arith.extui %0 : i1 to i32
    %c0_i32_0 = arith.constant 0 : i32
    %2 = arith.cmpi ne, %1, %c0_i32_0 : i32
    scf.if %2 {
      %c0_6 = arith.constant 0 : index
      %c0_7 = arith.constant 0 : index
      %7 = vector.load %arg2[%c0_6, %c0_7] : memref<8x32xf32, #tpu.memory_space<vmem>>, vector<8x32xf32>
      %8 = arith.mulf %7, %7 : vector<8x32xf32>
      %cst_8 = arith.constant dense<0.000000e+00> : vector<8xf32>
      %9 = vector.multi_reduction <add>, %8, %cst_8 [1] : vector<8x32xf32> to vector<8xf32>
      %10 = vector.shape_cast %9 : vector<8xf32> to vector<8x1xf32>
      %cst_9 = arith.constant 1.000000e-24 : f32
      %11 = vector.broadcast %cst_9 : f32 to vector<8x1xf32>
      %12 = arith.maximumf %10, %11 : vector<8x1xf32>
      %13 = math.rsqrt %12 : vector<8x1xf32>
      %cst_10 = arith.constant 3.000000e+01 : f32
      %14 = vector.broadcast %cst_10 : f32 to vector<8x1xf32>
      %15 = arith.mulf %14, %13 : vector<8x1xf32>
      %16 = vector.broadcast %15 : vector<8x1xf32> to vector<8x32xf32>
      %17 = arith.mulf %7, %16 : vector<8x32xf32>
      %18 = arith.truncf %17 : vector<8x32xf32> to vector<8x32xbf16>
      %c0_11 = arith.constant 0 : index
      %c0_12 = arith.constant 0 : index
      %19 = vector.load %arg5[%c0_11, %c0_12] : memref<8x32xbf16, #tpu.memory_space<vmem>>, vector<8x32xbf16>
      tpu.vector_store %arg5[%c0_11, %c0_12], %18 {strides = array<i32>} : memref<8x32xbf16, #tpu.memory_space<vmem>>, vector<8x32xbf16>,
    } else {
    }
    %c0 = arith.constant 0 : index
    %c0_1 = arith.constant 0 : index
    %3 = vector.load %arg5[%c0, %c0_1] : memref<8x32xbf16, #tpu.memory_space<vmem>>, vector<8x32xbf16>
    %c0_2 = arith.constant 0 : index
    %c0_3 = arith.constant 0 : index
    %4 = vector.load %arg3[%c0_2, %c0_3] : memref<32x128xbf16, #tpu.memory_space<vmem>>, vector<32x128xbf16>
    %cst = arith.constant dense<0.000000e+00> : vector<8x128xf32>
    %5 = tpu.matmul %3, %4, %cst {dimension_numbers = #tpu.dot_dimension_numbers<[1], [0], [0], [1], [0, 0, 1, 1], [], []>} : vector<8x32xbf16>, vector<32x128xbf16>, vector<8x128xf32> -> vector<8x128xf32>
    %c0_4 = arith.constant 0 : index
    %c0_5 = arith.constant 0 : index
    %6 = vector.load %arg4[%c0_4, %c0_5] : memref<8x128xf32, #tpu.memory_space<vmem>>, vector<8x128xf32>
    tpu.vector_store %arg4[%c0_4, %c0_5], %5 {strides = array<i32>} : memref<8x128xf32, #tpu.memory_space<vmem>>, vector<8x128xf32>,
    return
  }
  func.func @transform_0(%arg0: i32, %arg1: i32) -> (i32, i32) {
    %c0_i32 = arith.constant 0 : i32
    %c0_i32_0 = arith.constant 0 : i32
    return %arg0, %c0_i32 : i32, i32
  }
  func.func @transform_1(%arg0: i32, %arg1: i32) -> (i32, i32) {
    %c0_i32 = arith.constant 0 : i32
    %c0_i32_0 = arith.constant 0 : i32
    return %c0_i32, %arg1 : i32, i32
  }
  func.func @transform_2(%arg0: i32, %arg1: i32) -> (i32, i32) {
    %c0_i32 = arith.constant 0 : i32
    return %arg0, %arg1 : i32, i32
  }
}

</mosaic_0001>

<bundles_post_ra>
// kernel: tpu_custom_call.1
= control target key start
LH: loop header
LB: loop body
LE: loop exit
PB: predicated region body
PF: predicated region fallthrough
CT: control target
= control target key end

     0   :  { %7 = vsyncpa [#allocation4], 0  ;;  %s249_s0 = inlined_call_operand.hbm [shape: f32[8,32], index: 0, kind: input, shape index: {}]   ;;  %s250_s1 = inlined_call_operand.hbm [shape: bf16[32,128], index: 1, kind: input, shape index: {}]   ;;  %s251_s2 = inlined_call_operand.hbm [shape: f32[8,128], index: 2, kind: output, shape index: {}]  }
   0x1   :  { %8 = vsyncpa [#allocation7], 0 }
   0x2   :  { %9 = vsyncpa [#allocation5], 0  ;;  %s15_s11 = sshll.u32 %s249_s0, 4  ;;  %s218_s12 = smov [#allocation3]   ;;  %s16_s11 = int_to_ptr.hbm [resolvable:$true] %s15_s11 }
   0x3   :  { %s17_s13 = sshll.u32 %s218_s12, 4  ;;  %s25_s16 = sshll.u32 %s250_s1, 4  ;;  %s18_s13 = int_to_ptr.vmem [resolvable:$true] %s17_s13  ;;  %s26_s16 = int_to_ptr.hbm [resolvable:$true] %s25_s16 }
   0x4   :  { %20 = dma.hbm_to_vmem [thread:$0]  %s16_s11, 128, %s18_s13, [#allocation4]  }
   0x5   :  { %s219_s17 = smov [#allocation6]   ;;  %s220_s19 = smov 64  }
   0x6   :  { %s27_s18 = sshll.u32 %s219_s17, 4  ;;  %s221_s20 = smov 4   ;;  %s28_s18 = int_to_ptr.vmem [resolvable:$true] %s27_s18 }
   0x7   :  { %33 = dma.hbm_to_vmem [thread:$0]  %s26_s16, 256, %s28_s18, [#allocation7], %s220_s19, %s220_s19, %s221_s20  }
   0x8   :  { %212 = dma.done.wait [#allocation4], 128  }
   0x9   :  { %213 = vsyncadd [#allocation4], 4294967168 }
   0xa   :  { %214 = dma.done.wait [#allocation7], 256  }
   0xb   :  { %215 = vsyncadd [#allocation7], 4294967040  ;;  %v47_v0 = vld [vmem:[#allocation3] sm:$0xff]  ;;  %vm49_vm0 = vcmask 261120   ;;  %v132_v3 = vld [vmem:[#allocation6 + $0x8] sm:$0xff]  ;;  %vm67_vm4 = vcmask 257024  }
   0xc   :  { %v48_v1 = vmul.f32 %v47_v0, %v47_v0  ;;  %96 = vmatpush.bf16.msra.mxu0 %v132_v3  ;;  %v131_v4 = vld [vmem:[#allocation6] sm:$0xff]  ;;  %s222_s0 = smov [#allocation8]   ;;  %s111_s23 = sshll.u32 %s251_s2, 4  ;;  %s112_s23 = int_to_ptr.hbm [resolvable:$true] %s111_s23 }
   0xd   :  { %s109_s1 = sshll.u32 %s222_s0, 4  ;;  %s110_s1 = int_to_ptr.vmem [resolvable:$true] %s109_s1 }
   0xe   :  { %v50_v2 = vsel %vm49_vm0, %v48_v1, 0.0 }
   0xf   :  { %51 = vadd.xlane.f32.xlu0 %v50_v2 }
  0x10   :  { %97 = vmatpush.bf16.msra.mxu0 %v131_v4 }
  0x82   :  { %v52_v5 = vpop.xlane.xlu0 %51 }
  0x83   :  { %v53_v6 = vmax.f32 %v52_v5, 1e-24 }
  0x85   :  { %138 = vrsqrt.f32 %v53_v6  ;;  %vm60_vm2 = vweird.f32 %v53_v6 }
  0x8b   :  { %v139_v7 = vpop.eup %138 }
  0x8c   :  { %v55_v8 = vmul.f32 %v139_v7, %v53_v6  ;;  %vm61_vm1 = vweird.f32 %v139_v7 }
  0x8d   :  { %vm62_vm3 = vmor %vm60_vm2, %vm61_vm1 }
  0x8e   :  { %v56_v9 = vmul.f32 %v139_v7, %v55_v8 }
  0x90   :  { %v57_v10 = vmul.f32 0.5, %v56_v9 }
  0x92   :  { %v58_v11 = vsub.f32 1.5, %v57_v10 }
  0x94   :  { %v59_v12 = vmul.f32 %v139_v7, %v58_v11 }
  0x96   :  { %v63_v13 = vsel %vm62_vm3, %v139_v7, %v59_v12 }
  0x97   :  { %v64_v14 = vmul.f32 30.0, %v63_v13 }
  0x99   :  { %v65_v15 = vmul.f32 %v64_v14, %v47_v0 }
  0x9b   :  { %v66_v16 = vpack.c.bf16 %v65_v15, %v65_v15 }
  0x9d   :  { %68 = vst.msk [vmem:[#allocation2] sm:$0xf] %vm67_vm4, %v66_v16 }
  0xa4   :  { %v69_v17 = vld [vmem:[#allocation2] sm:$0xf] }
  0xa5   :  { %130 = vmatmul.msk.bf16.vlgmr.msra.gmra.mxu0 %vm49_vm0, %v69_v17 }
 0x122   :  { %v99_v18 = vpop.f32.mrf.mxu0 }
 0x123   :  { %103 = vst [vmem:[#allocation8] sm:$0xff] %v99_v18 }
 0x124   :  { %114 = dma.vmem_to_hbm [thread:$0]  %s110_s1, 128, %s112_s23, [#allocation5]  }
 0x12a   :  { %v101_v19 = vpop.f32.mrf.mxu0 }
 0x12b   :  { %216 = dma.done.wait [#allocation5], 128  }
 0x12c   :  { %217 = vsyncadd [#allocation5], 4294967168 }
 0x12d   :  { %119 = vsyncpa [#allocation4], 1 }
 0x12e   :  { %120 = vsyncpa [#allocation7], 1 }
 0x12f   :  { %121 = vsyncpa [#allocation5], 1 }

</bundles_post_ra>
